<compile_context>
chip_gen: v7x
topology: tpu7x:2x2x1
jax: 0.10.0
libtpu: 0.0.40
codegen_flags: <defaults>
</compile_context>

<pallas_src>
import functools

import jax
import jax.numpy as jnp
from jax import lax
from jax.experimental import pallas as pl
from jax.experimental.pallas import tpu as pltpu


def _round_up(a, b):
    return (a + b - 1) // b * b


def _conv2d_kernel(w_ref, b_ref, xb_ref, xh_ref, o_ref, xf_ref, *, kh, kw, rg):
    # w_ref : SMEM (kh*kw,) flattened weights
    # b_ref : SMEM (1,)     bias
    # xb_ref: VMEM (tile_oh, wt_in)      body rows of the input tile
    # xh_ref: VMEM (halo_rows, wt_in)    first rows of the *next* tile (row halo)
    # o_ref : VMEM (tile_oh, wt)         lane-dense output tile (wt % 128 == 0)
    # xf_ref: VMEM (tile_oh + halo_rows, wt_in) scratch: stitched body+halo tile
    tile_oh, wt = o_ref.shape
    halo_rows = xh_ref.shape[0]

    # Stitch body + row halo into one contiguous scratch tile (one VMEM pass),
    # so every row group below reads a contiguous (rg + kh - 1)-row window.
    xf_ref[:tile_oh, :] = xb_ref[...]
    xf_ref[tile_oh:tile_oh + halo_rows, :] = xh_ref[...]

    # Hoist SMEM scalar reads out of the loops (JAX does not CSE the splats).
    w = [w_ref[t] for t in range(kh * kw)]
    bias = b_ref[0]

    n_groups = tile_oh // rg

    def group(g, carry):
        r0 = pl.multiple_of(g * rg, rg)
        acc = jnp.zeros((rg, wt), jnp.float32)      # stays in vregs (rg == 8)
        for j in range(kw):
            # One lane-offset load per kernel column (column halo is zero-padded
            # in the wrapper, so pl.ds(j, wt) is always in-bounds).
            xg = xf_ref[pl.ds(r0, rg + kh - 1), pl.ds(j, wt)]
            for i in range(kh):
                # Row tap = sublane slice of the in-register window.
                acc = acc + xg[i:i + rg, :] * w[i * kw + j]
        o_ref[pl.ds(r0, rg), :] = acc + bias        # aligned, unmasked full-lane store
        return carry

    lax.fori_loop(0, n_groups, group, 0)


def conv2d_forward(x, weight, bias, *, tile_oh=None):
    """Pallas equivalent of Conv2D.forward: corr2d(x, weight) + bias."""
    H, W = x.shape
    kh, kw = weight.shape
    if kh > H or kw > W:
        raise ValueError("kernel larger than input")
    OH, OW = H - kh + 1, W - kw + 1

    rg = 8                                           # output rows per inner step
    halo_rows = _round_up(max(kh - 1, 1), 8)         # row-halo block height
    col_pad = _round_up(max(kw - 1, 1), 128)         # column halo (zero padded)

    wt = _round_up(OW, 128)                          # lane-dense output width
    wt_in = wt + col_pad                             # input tile width incl. halo

    if tile_oh is None:
        # Budget ~10 MiB for {2x body, 2x out, 2x halo, scratch} so the default
        # scoped-VMEM limit double-buffers on every generation (v5e/v6e/v7x).
        budget = 10 * 1024 * 1024
        rows = budget // ((3 * wt_in + 2 * wt) * 4)
        tile_oh = max(halo_rows, min(256, rows // halo_rows * halo_rows))
    tile_oh = min(tile_oh, _round_up(OH, halo_rows))
    tile_oh = max(halo_rows, _round_up(tile_oh, halo_rows))

    OH_pad = _round_up(OH, tile_oh)                  # padded output rows
    H_pad = OH_pad + halo_rows                       # padded input rows (covers halo)
    n_tiles = OH_pad // tile_oh
    halo_stride = tile_oh // halo_rows               # halo block index per tile

    # Zero-pad the image once in the wrapper: rows for the row halo of the last
    # tile, columns for lane density + the column halo.
    x_pad = jnp.zeros((H_pad, wt_in), jnp.float32).at[:H, :W].set(
        x.astype(jnp.float32))

    kernel = functools.partial(_conv2d_kernel, kh=kh, kw=kw, rg=rg)

    out_padded = pl.pallas_call(
        kernel,
        out_shape=jax.ShapeDtypeStruct((OH_pad, wt), jnp.float32),
        grid=(n_tiles,),
        in_specs=[
            pl.BlockSpec(memory_space=pltpu.MemorySpace.SMEM),   # weights (kh*kw,)
            pl.BlockSpec(memory_space=pltpu.MemorySpace.SMEM),   # bias (1,)
            # Body rows of tile i.
            pl.BlockSpec((tile_oh, wt_in), lambda i: (i, 0)),
            # Row halo: first `halo_rows` rows of tile i+1 (always in-bounds
            # thanks to the H_pad = OH_pad + halo_rows padding above).
            pl.BlockSpec((halo_rows, wt_in), lambda i: ((i + 1) * halo_stride, 0)),
        ],
        out_specs=pl.BlockSpec((tile_oh, wt), lambda i: (i, 0)),
        scratch_shapes=[pltpu.VMEM((tile_oh + halo_rows, wt_in), jnp.float32)],
        compiler_params=pltpu.CompilerParams(
            dimension_semantics=("parallel",),       # independent tiles -> both TCs on v7x
            vmem_limit_bytes=32 * 1024 * 1024,
        ),
    )(weight.reshape(-1).astype(jnp.float32),
      bias.astype(jnp.float32),
      x_pad, x_pad)

    return out_padded[:OH, :OW]


def _reference(x, weight, bias):
    """Pure-JAX corr2d + bias (same shifted-MAC formulation)."""
    kh, kw = weight.shape
    OH, OW = x.shape[0] - kh + 1, x.shape[1] - kw + 1
    ref = jnp.zeros((OH, OW), jnp.float32)
    for j in range(kw):
        for i in range(kh):
            ref = ref + x[i:i + OH, j:j + OW] * weight[i, j]
    return ref + bias[0]


if __name__ == "__main__":
    key = jax.random.PRNGKey(0)
    kx, kwt, kb, kx2 = jax.random.split(key, 4)

    # Primary case consistent with the module: one 16x16 image, 3x3 kernel.
    H, W, KH, KW = 16, 16, 3, 3
    x = jax.random.normal(kx, (H, W), dtype=jnp.float32)
    weight = jax.random.uniform(kwt, (KH, KW), dtype=jnp.float32)   # torch.rand init
    bias = jax.random.normal(kb, (1,), dtype=jnp.float32)

    out = jax.block_until_ready(conv2d_forward(x, weight, bias))
    ref = _reference(x, weight, bias)
    assert out.shape == ref.shape
    assert jnp.allclose(out, ref, atol=1e-5, rtol=1e-5)

    # Secondary check: force a small tile so the multi-tile grid + row-halo
    # stitching path is exercised (3 row tiles).
    H2, W2 = 40, 64
    x2 = jax.random.normal(kx2, (H2, W2), dtype=jnp.float32)
    out2 = jax.block_until_ready(conv2d_forward(x2, weight, bias, tile_oh=16))
    ref2 = _reference(x2, weight, bias)
    assert out2.shape == ref2.shape
    assert jnp.allclose(out2, ref2, atol=1e-5, rtol=1e-5)

    print("KERNEL_OK")
</pallas_src>

<mosaic_0001>
module attributes {stable_mosaic.version = 11 : i64} {
  func.func @_conv2d_kernel(%arg0: i32, %arg1: memref<9xf32, #tpu.memory_space<smem>>, %arg2: memref<1xf32, #tpu.memory_space<smem>>, %arg3: memref<16x256xf32, #tpu.memory_space<vmem>>, %arg4: memref<8x256xf32, #tpu.memory_space<vmem>>, %arg5: memref<16x128xf32, #tpu.memory_space<vmem>>, %arg6: memref<24x256xf32, #tpu.memory_space<vmem>>) attributes {dimension_semantics = [#tpu.dimension_semantics<parallel>], iteration_bounds = array<i64: 1>, scalar_prefetch = 0 : i64, scratch_operands = 1 : i64, tpu.core_type = #tpu.core_type<tc>, window_params = [{transform_indices = @transform_0, window_bounds = array<i64: 9>}, {transform_indices = @transform_1, window_bounds = array<i64: 1>}, {transform_indices = @transform_2, window_bounds = array<i64: 16, 256>}, {transform_indices = @transform_3, window_bounds = array<i64: 8, 256>}, {transform_indices = @transform_4, window_bounds = array<i64: 16, 128>}]} {
    %c0 = arith.constant 0 : index
    %c0_0 = arith.constant 0 : index
    %0 = vector.load %arg3[%c0, %c0_0] : memref<16x256xf32, #tpu.memory_space<vmem>>, vector<16x256xf32>
    %c0_1 = arith.constant 0 : index
    %c0_2 = arith.constant 0 : index
    %1 = vector.load %arg6[%c0_1, %c0_2] : memref<24x256xf32, #tpu.memory_space<vmem>>, vector<16x256xf32>
    tpu.vector_store %arg6[%c0_1, %c0_2], %0 {strides = array<i32>} : memref<24x256xf32, #tpu.memory_space<vmem>>, vector<16x256xf32>,
    %c0_3 = arith.constant 0 : index
    %c0_4 = arith.constant 0 : index
    %2 = vector.load %arg4[%c0_3, %c0_4] : memref<8x256xf32, #tpu.memory_space<vmem>>, vector<8x256xf32>
    %c16 = arith.constant 16 : index
    %c0_5 = arith.constant 0 : index
    %3 = vector.load %arg6[%c16, %c0_5] : memref<24x256xf32, #tpu.memory_space<vmem>>, vector<8x256xf32>
    tpu.vector_store %arg6[%c16, %c0_5], %2 {strides = array<i32>} : memref<24x256xf32, #tpu.memory_space<vmem>>, vector<8x256xf32>,
    %c0_6 = arith.constant 0 : index
    %4 = memref.load %arg1[%c0_6] : memref<9xf32, #tpu.memory_space<smem>>
    %c1 = arith.constant 1 : index
    %5 = memref.load %arg1[%c1] : memref<9xf32, #tpu.memory_space<smem>>
    %c2 = arith.constant 2 : index
    %6 = memref.load %arg1[%c2] : memref<9xf32, #tpu.memory_space<smem>>
    %c3 = arith.constant 3 : index
    %7 = memref.load %arg1[%c3] : memref<9xf32, #tpu.memory_space<smem>>
    %c4 = arith.constant 4 : index
    %8 = memref.load %arg1[%c4] : memref<9xf32, #tpu.memory_space<smem>>
    %c5 = arith.constant 5 : index
    %9 = memref.load %arg1[%c5] : memref<9xf32, #tpu.memory_space<smem>>
    %c6 = arith.constant 6 : index
    %10 = memref.load %arg1[%c6] : memref<9xf32, #tpu.memory_space<smem>>
    %c7 = arith.constant 7 : index
    %11 = memref.load %arg1[%c7] : memref<9xf32, #tpu.memory_space<smem>>
    %c8 = arith.constant 8 : index
    %12 = memref.load %arg1[%c8] : memref<9xf32, #tpu.memory_space<smem>>
    %c0_7 = arith.constant 0 : index
    %13 = memref.load %arg2[%c0_7] : memref<1xf32, #tpu.memory_space<smem>>
    %c0_i32 = arith.constant 0 : i32
    %c2_i32 = arith.constant 2 : i32
    %14 = arith.addi %c0_i32, %c2_i32 : i32
    %c1_i32 = arith.constant 1 : i32
    scf.for %arg7 = %c0_i32 to %14 step %c1_i32  : i32 {
      %c8_i32 = arith.constant 8 : i32
      %15 = arith.muli %arg7, %c8_i32 : i32
      %16 = tpu.assume_multiple %15, 8 : i32
      %cst = arith.constant 0.000000e+00 : f32
      %17 = vector.broadcast %cst : f32 to vector<8x128xf32>
      %18 = arith.index_cast %16 : i32 to index
      %c0_9 = arith.constant 0 : index
      %19 = vector.load %arg6[%18, %c0_9] : memref<24x256xf32, #tpu.memory_space<vmem>>, vector<10x128xf32>
      %20 = vector.extract_strided_slice %19 {offsets = [0, 0], sizes = [8, 128], strides = [1, 1]} : vector<10x128xf32> to vector<8x128xf32>
      %21 = vector.broadcast %4 : f32 to vector<8x128xf32>
      %22 = arith.mulf %20, %21 : vector<8x128xf32>
      %23 = arith.addf %17, %22 : vector<8x128xf32>
      %24 = vector.extract_strided_slice %19 {offsets = [1, 0], sizes = [8, 128], strides = [1, 1]} : vector<10x128xf32> to vector<8x128xf32>
      %25 = vector.broadcast %7 : f32 to vector<8x128xf32>
      %26 = arith.mulf %24, %25 : vector<8x128xf32>
      %27 = arith.addf %23, %26 : vector<8x128xf32>
      %28 = vector.extract_strided_slice %19 {offsets = [2, 0], sizes = [8, 128], strides = [1, 1]} : vector<10x128xf32> to vector<8x128xf32>
      %29 = vector.broadcast %10 : f32 to vector<8x128xf32>
      %30 = arith.mulf %28, %29 : vector<8x128xf32>
      %31 = arith.addf %27, %30 : vector<8x128xf32>
      %32 = arith.index_cast %16 : i32 to index
      %c1_10 = arith.constant 1 : index
      %33 = vector.load %arg6[%32, %c1_10] : memref<24x256xf32, #tpu.memory_space<vmem>>, vector<10x128xf32>
      %34 = vector.extract_strided_slice %33 {offsets = [0, 0], sizes = [8, 128], strides = [1, 1]} : vector<10x128xf32> to vector<8x128xf32>
      %35 = vector.broadcast %5 : f32 to vector<8x128xf32>
      %36 = arith.mulf %34, %35 : vector<8x128xf32>
      %37 = arith.addf %31, %36 : vector<8x128xf32>
      %38 = vector.extract_strided_slice %33 {offsets = [1, 0], sizes = [8, 128], strides = [1, 1]} : vector<10x128xf32> to vector<8x128xf32>
      %39 = vector.broadcast %8 : f32 to vector<8x128xf32>
      %40 = arith.mulf %38, %39 : vector<8x128xf32>
      %41 = arith.addf %37, %40 : vector<8x128xf32>
      %42 = vector.extract_strided_slice %33 {offsets = [2, 0], sizes = [8, 128], strides = [1, 1]} : vector<10x128xf32> to vector<8x128xf32>
      %43 = vector.broadcast %11 : f32 to vector<8x128xf32>
      %44 = arith.mulf %42, %43 : vector<8x128xf32>
      %45 = arith.addf %41, %44 : vector<8x128xf32>
      %46 = arith.index_cast %16 : i32 to index
      %c2_11 = arith.constant 2 : index
      %47 = vector.load %arg6[%46, %c2_11] : memref<24x256xf32, #tpu.memory_space<vmem>>, vector<10x128xf32>
      %48 = vector.extract_strided_slice %47 {offsets = [0, 0], sizes = [8, 128], strides = [1, 1]} : vector<10x128xf32> to vector<8x128xf32>
      %49 = vector.broadcast %6 : f32 to vector<8x128xf32>
      %50 = arith.mulf %48, %49 : vector<8x128xf32>
      %51 = arith.addf %45, %50 : vector<8x128xf32>
      %52 = vector.extract_strided_slice %47 {offsets = [1, 0], sizes = [8, 128], strides = [1, 1]} : vector<10x128xf32> to vector<8x128xf32>
      %53 = vector.broadcast %9 : f32 to vector<8x128xf32>
      %54 = arith.mulf %52, %53 : vector<8x128xf32>
      %55 = arith.addf %51, %54 : vector<8x128xf32>
      %56 = vector.extract_strided_slice %47 {offsets = [2, 0], sizes = [8, 128], strides = [1, 1]} : vector<10x128xf32> to vector<8x128xf32>
      %57 = vector.broadcast %12 : f32 to vector<8x128xf32>
      %58 = arith.mulf %56, %57 : vector<8x128xf32>
      %59 = arith.addf %55, %58 : vector<8x128xf32>
      %60 = vector.broadcast %13 : f32 to vector<8x128xf32>
      %61 = arith.addf %59, %60 : vector<8x128xf32>
      %62 = arith.index_cast %16 : i32 to index
      %c0_12 = arith.constant 0 : index
      %63 = vector.load %arg5[%62, %c0_12] : memref<16x128xf32, #tpu.memory_space<vmem>>, vector<8x128xf32>
      tpu.vector_store %arg5[%62, %c0_12], %61 {strides = array<i32>} : memref<16x128xf32, #tpu.memory_space<vmem>>, vector<8x128xf32>,
    }
    %c2_i32_8 = arith.constant 2 : i32
    return
  }
  func.func @transform_0(%arg0: i32) -> i32 {
    %c0_i32 = arith.constant 0 : i32
    %c0_i32_0 = arith.constant 0 : i32
    return %c0_i32 : i32
  }
  func.func @transform_1(%arg0: i32) -> i32 {
    %c0_i32 = arith.constant 0 : i32
    %c0_i32_0 = arith.constant 0 : i32
    return %c0_i32 : i32
  }
  func.func @transform_2(%arg0: i32) -> (i32, i32) {
    %c0_i32 = arith.constant 0 : i32
    %c0_i32_0 = arith.constant 0 : i32
    return %arg0, %c0_i32 : i32, i32
  }
  func.func @transform_3(%arg0: i32) -> (i32, i32) {
    %c1_i32 = arith.constant 1 : i32
    %0 = arith.addi %arg0, %c1_i32 : i32
    %c2_i32 = arith.constant 2 : i32
    %1 = arith.muli %0, %c2_i32 : i32
    %c0_i32 = arith.constant 0 : i32
    %c0_i32_0 = arith.constant 0 : i32
    return %1, %c0_i32 : i32, i32
  }
  func.func @transform_4(%arg0: i32) -> (i32, i32) {
    %c0_i32 = arith.constant 0 : i32
    %c0_i32_0 = arith.constant 0 : i32
    return %arg0, %c0_i32 : i32, i32
  }
}

</mosaic_0001>

<bundles_post_ra>
// kernel: tpu_custom_call.1
= control target key start
LH: loop header
LB: loop body
LE: loop exit
PB: predicated region body
PF: predicated region fallthrough
CT: control target
= control target key end

     0   :  { %10 = vsyncpa [#allocation7], 0  ;;  %s541_s0 = inlined_call_operand.vmem [shape: f32[9], index: 0, kind: input, shape index: {}]   ;;  %s542_s1 = inlined_call_operand.<no memory space> [shape: f32[1], index: 1, kind: input, shape index: {}]   ;;  %s543_s2 = inlined_call_operand.hbm [shape: f32[24,256], index: 2, kind: input, shape index: {}]   ;;  %s544_s3 = inlined_call_operand.hbm [shape: f32[24,256], index: 3, kind: input, shape index: {}]   ;;  %s545_s4 = inlined_call_operand.hbm [shape: f32[16,128], index: 4, kind: output, shape index: {}]  }
   0x1   :  { %11 = vsyncpa [#allocation5], 0 }
   0x2   :  { %12 = vsyncpa [#allocation10], 0 }
   0x3   :  { %13 = vsyncpa [#allocation6], 0  ;;  %s20_s17 = sshll.u32 %s541_s0, 4  ;;  %s21_s17 = int_to_ptr.vmem [resolvable:$true] %s20_s17 }
   0x4   :  { %s305_s18 = scalar_lea.vmem %s21_s17, 16  ;;  %p310_p1 = scmp.lt.s32.totalorder %s21_s17, %s21_s17 }
   0x5   :  { %p306_p0 = scmp.ne.s32.totalorder %s21_s17, %s305_s18  ;;  %p311_p2 = scmp.lt.s32.totalorder %s305_s18, %s305_s18 }
   0x7   :  { %p312_p3 = por %p311_p2, %p310_p1 }
   0x9   :  { %p313_p4 = pnand %p312_p3, %p306_p0 }
   0xb   :  { %316 = shalt.err (!%p313_p4)
}
   0xc   :  { %s402_s19 = smov [#allocation4]   ;;  %s403_s20 = smov [#allocation8]  }
   0xd   :  { %23 = dma.vmem_to_smem %s21_s17, 16, %s402_s19, [#allocation7]  }
   0xe   :  { %s31_s21 = sshll.u32 %s403_s20, 4  ;;  %s317_s24 = scalar_lea.hbm %s543_s2, 512  ;;  %s32_s21 = int_to_ptr.vmem [resolvable:$true] %s31_s21 }
   0xf   :  { %p318_p5 = scmp.ne.s32.totalorder %s543_s2, %s317_s24  ;;  %s319_s28 = scalar_lea.hbm %s543_s2, 768 }
  0x10   :  { %p320_p6 = scmp.lt.u32.totalorder %s319_s28, %s317_s24  ;;  %p321_p7 = scmp.lt.u32.totalorder %s317_s24, %s543_s2 }
  0x12   :  { %p322_p8 = por %p321_p7, %p320_p6 }
  0x14   :  { %p323_p9 = pnand %p322_p8, %p318_p5 }
  0x16   :  { %326 = shalt.err (!%p323_p9)
}
  0x17   :  { %s327_s5 = scalar_lea.vmem %s32_s21, 512  ;;  %p332_p11 = scmp.lt.s32.totalorder %s32_s21, %s32_s21 }
  0x18   :  { %p328_p10 = scmp.ne.s32.totalorder %s32_s21, %s327_s5  ;;  %p333_p12 = scmp.lt.s32.totalorder %s327_s5, %s327_s5 }
  0x1a   :  { %p334_p13 = por %p333_p12, %p332_p11 }
  0x1c   :  { %p335_p0 = pnand %p334_p13, %p328_p10 }
  0x1e   :  { %338 = shalt.err (!%p335_p0)
}
  0x1f   :  { %s404_s6 = smov 256   ;;  %s405_s7 = smov 16  }
  0x20   :  { %37 = dma.hbm_to_vmem [thread:$0]  %s543_s2, 512, %s32_s21, [#allocation5], %s404_s6, %s404_s6, %s405_s7  }
  0x21   :  { %s265_s12 = scalar_lea.hbm %s544_s3, 512  ;;  %s406_s13 = smov [#allocation9]  }
  0x22   :  { %s49_s14 = sshll.u32 %s406_s13, 4  ;;  %s363_s17 = scalar_lea.hbm %s544_s3, 768  ;;  %s50_s14 = int_to_ptr.vmem [resolvable:$true] %s49_s14 }
  0x23   :  { %p340_p1 = scmp.ne.s32.totalorder %s265_s12, %s363_s17  ;;  %p342_p2 = scmp.lt.u32.totalorder %s265_s12, %s544_s3 }
  0x24   :  { %p343_p3 = scmp.lt.u32.totalorder %s363_s17, %s363_s17  ;;  %p345_p5 = scmp.lt.u32.totalorder %s363_s17, %s265_s12 }
  0x26   :  { %p344_p4 = por %p343_p3, %p342_p2 }
  0x28   :  { %p346_p6 = por %p345_p5, %p344_p4 }
  0x2a   :  { %p347_p7 = pnand %p346_p6, %p340_p1 }
  0x2c   :  { %350 = shalt.err (!%p347_p7)
}
  0x2d   :  { %s351_s2 = scalar_lea.vmem %s50_s14, 256  ;;  %p356_p9 = scmp.lt.s32.totalorder %s50_s14, %s50_s14 }
  0x2e   :  { %p352_p8 = scmp.ne.s32.totalorder %s50_s14, %s351_s2  ;;  %p357_p10 = scmp.lt.s32.totalorder %s351_s2, %s351_s2 }
  0x30   :  { %p358_p11 = por %p357_p10, %p356_p9 }
  0x32   :  { %p359_p12 = pnand %p358_p11, %p352_p8 }
  0x34   :  { %362 = shalt.err (!%p359_p12)
}
  0x35   :  { %52 = dma.hbm_to_vmem [thread:$0]  %s265_s12, 256, %s50_s14, [#allocation10]  }
  0x36   :  { %390 = dma.done.wait [#allocation7], 16  }
  0x37   :  { %391 = vsyncadd [#allocation7], 4294967280 }
  0x38   :  { %392 = dma.done.wait [#allocation5], 512  }
  0x39   :  { %393 = vsyncadd [#allocation5], 4294966784 }
  0x3a   :  { %394 = dma.done.wait [#allocation10], 256  }
  0x3b   :  { %395 = vsyncadd [#allocation10], 4294967040 }
  0x3c   :  { %62 = sfence }
  0x3d   :  { %v65_v0 = vld [vmem:[#allocation8] sm:$0xff]  ;;  %v66_v1 = vld [vmem:[#allocation8 + $0x8] sm:$0xff]  ;;  %v67_v2 = vld [vmem:[#allocation8 + $0x10] sm:$0xff]  ;;  %s464_s3 = sld [smem:[#allocation4]]  ;;  %s466_s20 = sld [smem:[#allocation4 + $0x1]] }
  0x3e   :  { %69 = vst [vmem:[#allocation2] sm:$0xff] %v65_v0  ;;  %70 = vst [vmem:[#allocation2 + $0x8] sm:$0xff] %v66_v1  ;;  %v68_v3 = vld [vmem:[#allocation8 + $0x18] sm:$0xff]  ;;  %v73_v4 = vld [vmem:[#allocation9] sm:$0xff]  ;;  %s468_s21 = sld [smem:[#allocation4 + $0x2]]  ;;  %s470_s22 = sld [smem:[#allocation4 + $0x3]] }
  0x3f   :  { %71 = vst [vmem:[#allocation2 + $0x10] sm:$0xff] %v67_v2  ;;  %v74_v5 = vld [vmem:[#allocation9 + $0x8] sm:$0xff]  ;;  %72 = vst [vmem:[#allocation2 + $0x18] sm:$0xff] %v68_v3  ;;  %s472_s23 = sld [smem:[#allocation4 + $0x4]]  ;;  %s474_s24 = sld [smem:[#allocation4 + $0x5]] }
  0x40   :  { %75 = vst [vmem:[#allocation2 + $0x20] sm:$0xff] %v73_v4  ;;  %76 = vst [vmem:[#allocation2 + $0x28] sm:$0xff] %v74_v5  ;;  %s476_s25 = sld [smem:[#allocation4 + $0x6]]  ;;  %s478_s26 = sld [smem:[#allocation4 + $0x7]] }
  0x41   :  { %s480_s0 = sld [smem:[#allocation4 + $0x8]]  ;;  %s482_s27 = smov 0  }
  0x42 LB: > { %s283_s28 = sshll.u32 %s400_s27, 3  ;;  %vm109_vm0 = vcmask 1046528   ;;  %s407_s6 = smov 126   ;;  %vm120_vm1 = vcmask 1045504   ;;  %vm137_vm2 = vcmask 1039360   ;;  %vm194_vm3 = vcmask 1031168   ;;  %s400_s27 = sphi %s482_s27, %s92_s27  }
  0x43   : > { %s94_s29 = sshra.s32 %s283_s28, 3  ;;  %v128_v7 = vstv %s466_s20  ;;  %s408_s7 = smov 127   ;;  %v101_v45 = vstv %s464_s3 }
  0x44   : > { %s286_s30 = sshll.u32 %s94_s29, 4  ;;  %v185_v6 = vstv %s468_s21  ;;  %v104_v42 = vstv %s470_s22  ;;  %s244_s10 = scalar_lea.vmem [#allocation11], %s283_s28 }
  0x45   : > { %v141_v8 = vstv %s472_s23  ;;  %s98_s5 = scalar_lea.vmem [#allocation2], %s286_s30  ;;  %v198_v24 = vstv %s474_s24  ;;  %s92_s27 = sadd.s32 1, %s400_s27  }
  0x46   : > { %v163_v12 = vstv %s478_s26  ;;  %v115_v43 = vstv %s476_s25  ;;  %p89_p13 = scmp.ge.s32.totalorder %s92_s27, 2  }
  0x47   : > { %v126_v9 = vld [vmem:[%s98_s5 + $0x8] sm:$0xff]  ;;  %v99_v10 = vld [vmem:[%s98_s5] sm:$0xff]  ;;  %v100_v11 = vld [vmem:[%s98_s5 + $0x10] sm:$0x3]  ;;  %v220_v35 = vstv %s480_s0  ;;  %s409_s11 = smov (%p89_p13), [#allocation11]  }
  0x48   : > { %v187_v13 = vmul.f32 %v185_v6, %v126_v9  ;;  %v129_v14 = vmul.f32 %v128_v7, %v99_v10  ;;  %v130_v15 = vmul.f32 %v128_v7, %v126_v9  ;;  %v127_v16 = vld [vmem:[%s98_s5 + $0x18] sm:$0x3]  ;;  %v142_v17 = vmul.f32 %v141_v8, %v99_v10  ;;  %s251_s12 = sshll.u32 (%p89_p13), %s409_s11, 4  ;;  %s252_s12 = int_to_ptr.vmem [resolvable:$true] %s251_s12 }
  0x49   : > { %v144_v18 = vmul.f32 %v141_v8, %v100_v11  ;;  %v143_v19 = vmul.f32 %v141_v8, %v126_v9  ;;  %v145_v20 = vmul.f32 %v141_v8, %v127_v16  ;;  %v165_v21 = vmul.f32 %v163_v12, %v126_v9  ;;  %s364_s13 = scalar_lea.vmem (%p89_p13), %s252_s12, 256  ;;  %p369_p1 = scmp.lt.s32.totalorder (%p89_p13), %s252_s12, %s252_s12 }
  0x4a   : > { %192 = vrot.lane.b32.xlu1 %v187_v13, %s407_s6  ;;  %133 = vrot.lane.b32.xlu0 %v129_v14, %s408_s7  ;;  %v167_v22 = vmul.f32 %v163_v12, %v127_v16  ;;  %v164_v23 = vmul.f32 %v163_v12, %v99_v10  ;;  %v150_v25 = vrot.slane %v142_v17, 1  ;;  %v166_v31 = vmul.f32 %v163_v12, %v100_v11  ;;  %p365_p0 = scmp.ne.s32.totalorder (%p89_p13), %s252_s12, %s364_s13  ;;  %p370_p2 = scmp.lt.s32.totalorder (%p89_p13), %s364_s13, %s364_s13 }
  0x4b   : > { %v151_v26 = vrot.slane %v144_v18, 1  ;;  %v153_v27 = vrot.slane %v143_v19, 1  ;;  %v154_v28 = vrot.slane %v145_v20, 1  ;;  %v175_v29 = vrot.slane %v165_v21, 2 }
  0x4c   : > { %v176_v30 = vrot.slane %v167_v22, 2  ;;  %v200_v33 = vmul.f32 %v198_v24, %v126_v9  ;;  %v202_v34 = vmul.f32 %v198_v24, %v127_v16  ;;  %v186_v36 = vmul.f32 %v185_v6, %v99_v10  ;;  %p371_p3 = por (%p89_p13), %p370_p2, %p369_p1 }
  0x4d   : > { %v152_v32 = vsel %vm109_vm0, %v150_v25, %v151_v26  ;;  %v172_v37 = vrot.slane %v164_v23, 2  ;;  %v173_v38 = vrot.slane %v166_v31, 2  ;;  %v199_v39 = vmul.f32 %v198_v24, %v99_v10 }
  0x4e   : > { %156 = vrot.lane.b32.xlu1 %v152_v32, %s408_s7  ;;  %135 = vrot.lane.b32.xlu0 %v130_v15, %s408_s7  ;;  %v155_v40 = vsel %vm109_vm0, %v153_v27, %v154_v28  ;;  %v201_v41 = vmul.f32 %v198_v24, %v100_v11  ;;  %v177_v44 = vsel %vm120_vm1, %v175_v29, %v176_v30  ;;  %v210_v46 = vrot.slane %v200_v33, 1  ;;  %p372_p4 = pnand (%p89_p13), %p371_p3, %p365_p0 }
  0x4f   : > { %v211_v47 = vrot.slane %v202_v34, 1  ;;  %v222_v48 = vmul.f32 %v220_v35, %v126_v9  ;;  %v224_v49 = vmul.f32 %v220_v35, %v127_v16  ;;  %v174_v50 = vsel %vm120_vm1, %v172_v37, %v173_v38 }
  0x50   : > { %v207_v51 = vrot.slane %v199_v39, 1  ;;  %v106_v52 = vmul.f32 %v104_v42, %v100_v11  ;;  %v117_v53 = vmul.f32 %v115_v43, %v100_v11  ;;  %v208_v54 = vrot.slane %v201_v41, 1 }
  0x51   : > { %v221_v55 = vmul.f32 %v220_v35, %v99_v10  ;;  %v223_v56 = vmul.f32 %v220_v35, %v100_v11  ;;  %v105_v57 = vmul.f32 %v104_v42, %v99_v10  ;;  %v102_v60 = vmul.f32 %v101_v45, %v99_v10 }
  0x52   : > { %158 = vrot.lane.b32.xlu1 %v155_v40, %s408_s7  ;;  %190 = vrot.lane.b32.xlu0 %v186_v36, %s407_s6  ;;  %v111_v58 = vrot.slane %v106_v52, 1  ;;  %v122_v59 = vrot.slane %v117_v53, 2  ;;  %v116_v61 = vmul.f32 %v115_v43, %v99_v10  ;;  %v212_v63 = vsel %vm109_vm0, %v210_v46, %v211_v47 }
  0x53   : > { %v110_v62 = vrot.slane %v105_v57, 1  ;;  %v232_v0 = vrot.slane %v222_v48, 2  ;;  %v233_v1 = vrot.slane %v224_v49, 2  ;;  %v209_v3 = vsel %vm109_vm0, %v207_v51, %v208_v54 }
  0x54   : > { %v121_v2 = vrot.slane %v116_v61, 2  ;;  %v229_v4 = vrot.slane %v221_v55, 2  ;;  %v230_v5 = vrot.slane %v223_v56, 2  ;;  %v242_v34 = vstv %s542_s1 }
  0x55   : > { %v112_v6 = vsel %vm109_vm0, %v110_v62, %v111_v58  ;;  %v234_v10 = vsel %vm120_vm1, %v232_v0, %v233_v1 }
  0x56   : > { %180 = vrot.lane.b32.xlu1 %v177_v44, %s408_s7  ;;  %178 = vrot.lane.b32.xlu0 %v174_v50, %s408_s7  ;;  %v114_v7 = vadd.f32 %v112_v6, %v102_v60  ;;  %v123_v8 = vsel %vm120_vm1, %v121_v2, %v122_v59  ;;  %v231_v11 = vsel %vm120_vm1, %v229_v4, %v230_v5 }
  0x58   : > { %v125_v9 = vadd.f32 %v123_v8, %v114_v7 }
  0x5a   : > { %215 = vrot.lane.b32.xlu1 %v212_v63, %s407_s6  ;;  %213 = vrot.lane.b32.xlu0 %v209_v3, %s407_s6 }
  0x5e   : > { %237 = vrot.lane.b32.xlu1 %v234_v10, %s407_s6  ;;  %235 = vrot.lane.b32.xlu0 %v231_v11, %s407_s6 }
  0xbc   : > { %v193_v12 = vpop.permute.xlu1 %192  ;;  %v134_v13 = vpop.permute.xlu0 %133 }
  0xc0   : > { %v157_v14 = vpop.permute.xlu1 %156  ;;  %v136_v15 = vpop.permute.xlu0 %135 }
  0xc1   : > { %v138_v16 = vsel %vm137_vm2, %v134_v13, %v136_v15 }
  0xc2   : > { %v140_v20 = vadd.f32 %v138_v16, %v125_v9 }
  0xc4   : > { %v159_v17 = vpop.permute.xlu1 %158  ;;  %v191_v18 = vpop.permute.xlu0 %190 }
  0xc5   : > { %v160_v19 = vsel %vm137_vm2, %v157_v14, %v159_v17  ;;  %v195_v26 = vsel %vm194_vm3, %v191_v18, %v193_v12 }
  0xc6   : > { %v162_v21 = vadd.f32 %v160_v19, %v140_v20 }
  0xc8   : > { %v181_v22 = vpop.permute.xlu1 %180  ;;  %v179_v23 = vpop.permute.xlu0 %178 }
  0xc9   : > { %v182_v24 = vsel %vm137_vm2, %v179_v23, %v181_v22 }
  0xca   : > { %v184_v25 = vadd.f32 %v182_v24, %v162_v21 }
  0xcc   : > { %v216_v27 = vpop.permute.xlu1 %215  ;;  %v214_v28 = vpop.permute.xlu0 %213  ;;  %v197_v29 = vadd.f32 %v195_v26, %v184_v25 }
  0xcd   : > { %v217_v30 = vsel %vm194_vm3, %v214_v28, %v216_v27 }
  0xce   : > { %v219_v31 = vadd.f32 %v217_v30, %v197_v29 }
  0xd0   : > { %v238_v32 = vpop.permute.xlu1 %237  ;;  %v236_v33 = vpop.permute.xlu0 %235  ;;  %91 = sbr.rel (!%p89_p13) target bundleno = 66 (0x42), region = 58 }
  0xd1   : > { %v239_v35 = vsel %vm194_vm3, %v236_v33, %v238_v32 }
  0xd2   : > { %v241_v36 = vadd.f32 %v239_v35, %v219_v31 }
  0xd4   : > { %v243_v37 = vadd.f32 %v242_v34, %v241_v36 }
  0xd6   : > { %245 = vst [vmem:[%s244_s10] sm:$0xff] %v243_v37 }
  0xd7   :  { %375 = shalt.err (!%p372_p4)
}
  0xd8   :  { %s376_s16 = scalar_lea.hbm %s545_s4, 256 }
  0xd9   :  { %p377_p5 = scmp.ne.s32.totalorder %s545_s4, %s376_s16  ;;  %p380_p6 = scmp.lt.u32.totalorder %s376_s16, %s545_s4 }
  0xdb   :  { %p382_p7 = pnand %p380_p6, %p377_p5 }
  0xdd   :  { %385 = shalt.err (!%p382_p7)
}
  0xde   :  { %s410_s1 = smov 128   ;;  %s411_s3 = smov 8  }
  0xdf   :  { %257 = dma.vmem_to_hbm [thread:$0]  %s252_s12, 256, %s545_s4, [#allocation6], %s410_s1, %s410_s1, %s411_s3  }
  0xe0   :  { %396 = dma.done.wait [#allocation6], 256  }
  0xe1   :  { %397 = vsyncadd [#allocation6], 4294967040 }
  0xe2   :  { %261 = vsyncpa [#allocation5], 1 }
  0xe3   :  { %262 = vsyncpa [#allocation10], 1 }
  0xe4   :  { %263 = vsyncpa [#allocation6], 1 }
  0xe5   :  { %264 = vsyncpa [#allocation7], 1 }

</bundles_post_ra>
